<compile_context>
chip_gen: v6e
topology: v6e:2x2x1
jax: 0.10.0
libtpu: 0.0.40
codegen_flags: <defaults>
</compile_context>

<pallas_src>
import math

import jax
import jax.numpy as jnp
from jax import lax
from jax.experimental import pallas as pl
from jax.experimental.pallas import tpu as pltpu

D_MODEL = 64
N_HEAD = 4
HEAD_SIZE = D_MODEL // N_HEAD


def mha_kernel(x_ref, wqkv_ref, bqkv_ref, wo_ref, bo_ref, o_ref):
    # x_ref block: (1, S, D)
    S = x_ref.shape[1]
    x = x_ref[0]                                            # (S, D) f32

    # Single fused, lane-dense projection for all heads' Q, K, V.
    # N = 3*D = 192 >= 128, so the MXU output and stores are unmasked.
    qkv = jnp.dot(x, wqkv_ref[...], preferred_element_type=jnp.float32)
    qkv = qkv + bqkv_ref[...]                               # (S, 3*D)

    acc = jnp.zeros((S, D_MODEL), jnp.float32)
    for h in range(N_HEAD):                                 # static unroll, N_HEAD = 4
        lo, hi = h * HEAD_SIZE, (h + 1) * HEAD_SIZE
        q = qkv[:, lo:hi]                                   # (S, hs)  (scale pre-folded)
        k = qkv[:, D_MODEL + lo:D_MODEL + hi]               # (S, hs)
        v = qkv[:, 2 * D_MODEL + lo:2 * D_MODEL + hi]       # (S, hs)

        # q @ k^T without materializing a transposed copy of k.
        scores = lax.dot_general(q, k, (((1,), (1,)), ((), ())),
                                 preferred_element_type=jnp.float32)   # (S, S)

        # numerically-stable softmax; divide goes to the EUP via approx recip.
        m = jnp.max(scores, axis=-1, keepdims=True)
        e = jnp.exp(scores - m)
        denom = jnp.sum(e, axis=-1, keepdims=True)
        p = e * pl.reciprocal(denom, approx=True)

        head_out = jnp.dot(p, v, preferred_element_type=jnp.float32)   # (S, hs)

        # Accumulate directly into the output projection using the matching
        # row-slice of W_o — algebraically identical to concat(heads) @ W_o.
        acc = acc + jnp.dot(head_out, wo_ref[lo:hi, :],
                            preferred_element_type=jnp.float32)

    o_ref[0] = (acc + bo_ref[...]).astype(o_ref.dtype)


def multi_head_attention(x, params):
    B, S, D = x.shape
    assert D == D_MODEL
    wq, wk, wv, bq, bk, bv, wo, bo = params
    scale = 1.0 / math.sqrt(HEAD_SIZE)   # = 0.25, exact power of two

    # Pack per-head projections into one (D, 3*D) matrix [Q_heads|K_heads|V_heads]
    # and fold the softmax scale into the Q columns / bias (wrapper-side, cheap).
    def heads_to_cols(w):                 # (n_head, D, hs) -> (D, n_head*hs)
        return jnp.moveaxis(w, 0, 1).reshape(D_MODEL, D_MODEL)

    w_qkv = jnp.concatenate(
        [heads_to_cols(wq) * scale, heads_to_cols(wk), heads_to_cols(wv)], axis=-1)
    b_qkv = jnp.concatenate(
        [bq.reshape(1, D_MODEL) * scale,
         bk.reshape(1, D_MODEL),
         bv.reshape(1, D_MODEL)], axis=-1)

    full = lambda arr: pl.BlockSpec(arr.shape, lambda b: (0,) * arr.ndim)

    return pl.pallas_call(
        mha_kernel,
        out_shape=jax.ShapeDtypeStruct((B, S, D), x.dtype),
        grid=(B,),
        in_specs=[
            pl.BlockSpec((1, S, D), lambda b: (b, 0, 0)),    # x
            full(w_qkv),                                     # fused W_qkv (64, 192)
            full(b_qkv),                                     # fused b_qkv (1, 192)
            full(wo),                                        # W_o (64, 64)
            full(bo),                                        # b_o (1, 64)
        ],
        out_specs=pl.BlockSpec((1, S, D), lambda b: (b, 0, 0)),
        compiler_params=pltpu.CompilerParams(
            dimension_semantics=("parallel",)),              # 2 TCs on v7x at B>=2
    )(x, w_qkv, b_qkv, wo, bo)


def init_params(key):
    """Deterministic init matching nn.Linear shapes (uniform(-1/sqrt(in), 1/sqrt(in)))."""
    ks = jax.random.split(key, 8)
    bound = 1.0 / math.sqrt(D_MODEL)

    def u(k, shape):
        return jax.random.uniform(k, shape, jnp.float32, -bound, bound)

    # per-head projection weights, stored transposed: (n_head, in=D, out=head_size)
    wq = u(ks[0], (N_HEAD, D_MODEL, HEAD_SIZE))
    wk = u(ks[1], (N_HEAD, D_MODEL, HEAD_SIZE))
    wv = u(ks[2], (N_HEAD, D_MODEL, HEAD_SIZE))
    bq = u(ks[3], (N_HEAD, 1, HEAD_SIZE))
    bk = u(ks[4], (N_HEAD, 1, HEAD_SIZE))
    bv = u(ks[5], (N_HEAD, 1, HEAD_SIZE))
    # output projection: (in=D, out=D), bias (1, D)
    wo = u(ks[6], (D_MODEL, D_MODEL))
    bo = u(ks[7], (1, D_MODEL))
    return (wq, wk, wv, bq, bk, bv, wo, bo)


def reference_mha(x, params):
    """Pure-JAX reference mirroring the PyTorch module (exact f32 softmax)."""
    wq, wk, wv, bq, bk, bv, wo, bo = params
    outs = []
    for h in range(N_HEAD):
        q = x @ wq[h] + bq[h]
        k = x @ wk[h] + bk[h]
        v = x @ wv[h] + bv[h]
        a = (q @ jnp.swapaxes(k, -2, -1)) / math.sqrt(HEAD_SIZE)
        a = jax.nn.softmax(a, axis=-1)
        outs.append(a @ v)
    cat = jnp.concatenate(outs, axis=-1)
    return cat @ wo + bo


if __name__ == "__main__":
    key = jax.random.PRNGKey(0)
    k_param, k_x = jax.random.split(key)

    B, S = 2, 8
    x = jax.random.normal(k_x, (B, S, D_MODEL), jnp.float32)
    params = init_params(k_param)

    out = jax.block_until_ready(multi_head_attention(x, params))

    ref = reference_mha(x, params)
    assert out.shape == (B, S, D_MODEL)
    # Tolerance loosened from 1e-4: pl.reciprocal(approx=True) in the softmax
    # denominator introduces a small (~1e-4 relative) approximation error.
    assert jnp.allclose(out, ref, atol=2e-3, rtol=2e-3), "mismatch vs reference"

    print("KERNEL_OK")
</pallas_src>

<mosaic_0001>
module attributes {stable_mosaic.version = 11 : i64} {
  func.func @mha_kernel(%arg0: i32, %arg1: memref<1x8x64xf32, #tpu.memory_space<vmem>>, %arg2: memref<64x192xf32, #tpu.memory_space<vmem>>, %arg3: memref<1x192xf32, #tpu.memory_space<vmem>>, %arg4: memref<64x64xf32, #tpu.memory_space<vmem>>, %arg5: memref<1x64xf32, #tpu.memory_space<vmem>>, %arg6: memref<1x8x64xf32, #tpu.memory_space<vmem>>) attributes {dimension_semantics = [#tpu.dimension_semantics<parallel>], iteration_bounds = array<i64: 2>, scalar_prefetch = 0 : i64, scratch_operands = 0 : i64, tpu.core_type = #tpu.core_type<tc>, window_params = [{transform_indices = @transform_0, window_bounds = array<i64: 1, 8, 64>}, {pipeline_mode = #tpu.pipeline_mode<synchronous>, transform_indices = @transform_1, window_bounds = array<i64: 64, 192>}, {pipeline_mode = #tpu.pipeline_mode<synchronous>, transform_indices = @transform_2, window_bounds = array<i64: 1, 192>}, {pipeline_mode = #tpu.pipeline_mode<synchronous>, transform_indices = @transform_3, window_bounds = array<i64: 64, 64>}, {pipeline_mode = #tpu.pipeline_mode<synchronous>, transform_indices = @transform_4, window_bounds = array<i64: 1, 64>}, {transform_indices = @transform_5, window_bounds = array<i64: 1, 8, 64>}]} {
    %c0 = arith.constant 0 : index
    %c0_0 = arith.constant 0 : index
    %c0_1 = arith.constant 0 : index
    %0 = vector.load %arg1[%c0, %c0_0, %c0_1] : memref<1x8x64xf32, #tpu.memory_space<vmem>>, vector<1x8x64xf32>
    %1 = vector.shape_cast %0 : vector<1x8x64xf32> to vector<8x64xf32>
    %c0_2 = arith.constant 0 : index
    %c0_3 = arith.constant 0 : index
    %2 = vector.load %arg2[%c0_2, %c0_3] : memref<64x192xf32, #tpu.memory_space<vmem>>, vector<64x192xf32>
    %cst = arith.constant dense<0.000000e+00> : vector<8x192xf32>
    %3 = tpu.matmul %1, %2, %cst {dimension_numbers = #tpu.dot_dimension_numbers<[1], [0], [0], [1], [0, 0, 1, 1], [], []>} : vector<8x64xf32>, vector<64x192xf32>, vector<8x192xf32> -> vector<8x192xf32>
    %c0_4 = arith.constant 0 : index
    %c0_5 = arith.constant 0 : index
    %4 = vector.load %arg3[%c0_4, %c0_5] : memref<1x192xf32, #tpu.memory_space<vmem>>, vector<1x192xf32>
    %5 = vector.broadcast %4 : vector<1x192xf32> to vector<8x192xf32>
    %6 = arith.addf %3, %5 : vector<8x192xf32>
    %cst_6 = arith.constant 0.000000e+00 : f32
    %7 = vector.broadcast %cst_6 : f32 to vector<8x64xf32>
    %8 = vector.extract_strided_slice %6 {offsets = [0, 0], sizes = [8, 16], strides = [1, 1]} : vector<8x192xf32> to vector<8x16xf32>
    %9 = vector.extract_strided_slice %6 {offsets = [0, 64], sizes = [8, 16], strides = [1, 1]} : vector<8x192xf32> to vector<8x16xf32>
    %10 = vector.extract_strided_slice %6 {offsets = [0, 128], sizes = [8, 16], strides = [1, 1]} : vector<8x192xf32> to vector<8x16xf32>
    %cst_7 = arith.constant dense<0.000000e+00> : vector<8x8xf32>
    %11 = tpu.matmul %8, %9, %cst_7 {dimension_numbers = #tpu.dot_dimension_numbers<[1], [1], [0], [0], [0, 0, 1, 0], [], []>} : vector<8x16xf32>, vector<8x16xf32>, vector<8x8xf32> -> vector<8x8xf32>
    %cst_8 = arith.constant dense<0xFF800000> : vector<8xf32>
    %12 = vector.multi_reduction <maximumf>, %11, %cst_8 [1] : vector<8x8xf32> to vector<8xf32>
    %13 = vector.shape_cast %12 : vector<8xf32> to vector<8x1xf32>
    %14 = vector.broadcast %13 : vector<8x1xf32> to vector<8x8xf32>
    %15 = arith.subf %11, %14 : vector<8x8xf32>
    %16 = math.exp %15 : vector<8x8xf32>
    %cst_9 = arith.constant dense<0.000000e+00> : vector<8xf32>
    %17 = vector.multi_reduction <add>, %16, %cst_9 [1] : vector<8x8xf32> to vector<8xf32>
    %18 = vector.shape_cast %17 : vector<8xf32> to vector<8x1xf32>
    %19 = tpu.reciprocal %18 {approx = true} : vector<8x1xf32> -> vector<8x1xf32>
    %20 = vector.broadcast %19 : vector<8x1xf32> to vector<8x8xf32>
    %21 = arith.mulf %16, %20 : vector<8x8xf32>
    %cst_10 = arith.constant dense<0.000000e+00> : vector<8x16xf32>
    %22 = tpu.matmul %21, %10, %cst_10 {dimension_numbers = #tpu.dot_dimension_numbers<[1], [0], [0], [1], [0, 0, 1, 1], [], []>} : vector<8x8xf32>, vector<8x16xf32>, vector<8x16xf32> -> vector<8x16xf32>
    %c0_11 = arith.constant 0 : index
    %c0_12 = arith.constant 0 : index
    %23 = vector.load %arg4[%c0_11, %c0_12] : memref<64x64xf32, #tpu.memory_space<vmem>>, vector<16x64xf32>
    %cst_13 = arith.constant dense<0.000000e+00> : vector<8x64xf32>
    %24 = tpu.matmul %22, %23, %cst_13 {dimension_numbers = #tpu.dot_dimension_numbers<[1], [0], [0], [1], [0, 0, 1, 1], [], []>} : vector<8x16xf32>, vector<16x64xf32>, vector<8x64xf32> -> vector<8x64xf32>
    %25 = arith.addf %7, %24 : vector<8x64xf32>
    %26 = vector.extract_strided_slice %6 {offsets = [0, 16], sizes = [8, 16], strides = [1, 1]} : vector<8x192xf32> to vector<8x16xf32>
    %27 = vector.extract_strided_slice %6 {offsets = [0, 80], sizes = [8, 16], strides = [1, 1]} : vector<8x192xf32> to vector<8x16xf32>
    %28 = vector.extract_strided_slice %6 {offsets = [0, 144], sizes = [8, 16], strides = [1, 1]} : vector<8x192xf32> to vector<8x16xf32>
    %cst_14 = arith.constant dense<0.000000e+00> : vector<8x8xf32>
    %29 = tpu.matmul %26, %27, %cst_14 {dimension_numbers = #tpu.dot_dimension_numbers<[1], [1], [0], [0], [0, 0, 1, 0], [], []>} : vector<8x16xf32>, vector<8x16xf32>, vector<8x8xf32> -> vector<8x8xf32>
    %cst_15 = arith.constant dense<0xFF800000> : vector<8xf32>
    %30 = vector.multi_reduction <maximumf>, %29, %cst_15 [1] : vector<8x8xf32> to vector<8xf32>
    %31 = vector.shape_cast %30 : vector<8xf32> to vector<8x1xf32>
    %32 = vector.broadcast %31 : vector<8x1xf32> to vector<8x8xf32>
    %33 = arith.subf %29, %32 : vector<8x8xf32>
    %34 = math.exp %33 : vector<8x8xf32>
    %cst_16 = arith.constant dense<0.000000e+00> : vector<8xf32>
    %35 = vector.multi_reduction <add>, %34, %cst_16 [1] : vector<8x8xf32> to vector<8xf32>
    %36 = vector.shape_cast %35 : vector<8xf32> to vector<8x1xf32>
    %37 = tpu.reciprocal %36 {approx = true} : vector<8x1xf32> -> vector<8x1xf32>
    %38 = vector.broadcast %37 : vector<8x1xf32> to vector<8x8xf32>
    %39 = arith.mulf %34, %38 : vector<8x8xf32>
    %cst_17 = arith.constant dense<0.000000e+00> : vector<8x16xf32>
    %40 = tpu.matmul %39, %28, %cst_17 {dimension_numbers = #tpu.dot_dimension_numbers<[1], [0], [0], [1], [0, 0, 1, 1], [], []>} : vector<8x8xf32>, vector<8x16xf32>, vector<8x16xf32> -> vector<8x16xf32>
    %c16 = arith.constant 16 : index
    %c0_18 = arith.constant 0 : index
    %41 = vector.load %arg4[%c16, %c0_18] : memref<64x64xf32, #tpu.memory_space<vmem>>, vector<16x64xf32>
    %cst_19 = arith.constant dense<0.000000e+00> : vector<8x64xf32>
    %42 = tpu.matmul %40, %41, %cst_19 {dimension_numbers = #tpu.dot_dimension_numbers<[1], [0], [0], [1], [0, 0, 1, 1], [], []>} : vector<8x16xf32>, vector<16x64xf32>, vector<8x64xf32> -> vector<8x64xf32>
    %43 = arith.addf %25, %42 : vector<8x64xf32>
    %44 = vector.extract_strided_slice %6 {offsets = [0, 32], sizes = [8, 16], strides = [1, 1]} : vector<8x192xf32> to vector<8x16xf32>
    %45 = vector.extract_strided_slice %6 {offsets = [0, 96], sizes = [8, 16], strides = [1, 1]} : vector<8x192xf32> to vector<8x16xf32>
    %46 = vector.extract_strided_slice %6 {offsets = [0, 160], sizes = [8, 16], strides = [1, 1]} : vector<8x192xf32> to vector<8x16xf32>
    %cst_20 = arith.constant dense<0.000000e+00> : vector<8x8xf32>
    %47 = tpu.matmul %44, %45, %cst_20 {dimension_numbers = #tpu.dot_dimension_numbers<[1], [1], [0], [0], [0, 0, 1, 0], [], []>} : vector<8x16xf32>, vector<8x16xf32>, vector<8x8xf32> -> vector<8x8xf32>
    %cst_21 = arith.constant dense<0xFF800000> : vector<8xf32>
    %48 = vector.multi_reduction <maximumf>, %47, %cst_21 [1] : vector<8x8xf32> to vector<8xf32>
    %49 = vector.shape_cast %48 : vector<8xf32> to vector<8x1xf32>
    %50 = vector.broadcast %49 : vector<8x1xf32> to vector<8x8xf32>
    %51 = arith.subf %47, %50 : vector<8x8xf32>
    %52 = math.exp %51 : vector<8x8xf32>
    %cst_22 = arith.constant dense<0.000000e+00> : vector<8xf32>
    %53 = vector.multi_reduction <add>, %52, %cst_22 [1] : vector<8x8xf32> to vector<8xf32>
    %54 = vector.shape_cast %53 : vector<8xf32> to vector<8x1xf32>
    %55 = tpu.reciprocal %54 {approx = true} : vector<8x1xf32> -> vector<8x1xf32>
    %56 = vector.broadcast %55 : vector<8x1xf32> to vector<8x8xf32>
    %57 = arith.mulf %52, %56 : vector<8x8xf32>
    %cst_23 = arith.constant dense<0.000000e+00> : vector<8x16xf32>
    %58 = tpu.matmul %57, %46, %cst_23 {dimension_numbers = #tpu.dot_dimension_numbers<[1], [0], [0], [1], [0, 0, 1, 1], [], []>} : vector<8x8xf32>, vector<8x16xf32>, vector<8x16xf32> -> vector<8x16xf32>
    %c32 = arith.constant 32 : index
    %c0_24 = arith.constant 0 : index
    %59 = vector.load %arg4[%c32, %c0_24] : memref<64x64xf32, #tpu.memory_space<vmem>>, vector<16x64xf32>
    %cst_25 = arith.constant dense<0.000000e+00> : vector<8x64xf32>
    %60 = tpu.matmul %58, %59, %cst_25 {dimension_numbers = #tpu.dot_dimension_numbers<[1], [0], [0], [1], [0, 0, 1, 1], [], []>} : vector<8x16xf32>, vector<16x64xf32>, vector<8x64xf32> -> vector<8x64xf32>
    %61 = arith.addf %43, %60 : vector<8x64xf32>
    %62 = vector.extract_strided_slice %6 {offsets = [0, 48], sizes = [8, 16], strides = [1, 1]} : vector<8x192xf32> to vector<8x16xf32>
    %63 = vector.extract_strided_slice %6 {offsets = [0, 112], sizes = [8, 16], strides = [1, 1]} : vector<8x192xf32> to vector<8x16xf32>
    %64 = vector.extract_strided_slice %6 {offsets = [0, 176], sizes = [8, 16], strides = [1, 1]} : vector<8x192xf32> to vector<8x16xf32>
    %cst_26 = arith.constant dense<0.000000e+00> : vector<8x8xf32>
    %65 = tpu.matmul %62, %63, %cst_26 {dimension_numbers = #tpu.dot_dimension_numbers<[1], [1], [0], [0], [0, 0, 1, 0], [], []>} : vector<8x16xf32>, vector<8x16xf32>, vector<8x8xf32> -> vector<8x8xf32>
    %cst_27 = arith.constant dense<0xFF800000> : vector<8xf32>
    %66 = vector.multi_reduction <maximumf>, %65, %cst_27 [1] : vector<8x8xf32> to vector<8xf32>
    %67 = vector.shape_cast %66 : vector<8xf32> to vector<8x1xf32>
    %68 = vector.broadcast %67 : vector<8x1xf32> to vector<8x8xf32>
    %69 = arith.subf %65, %68 : vector<8x8xf32>
    %70 = math.exp %69 : vector<8x8xf32>
    %cst_28 = arith.constant dense<0.000000e+00> : vector<8xf32>
    %71 = vector.multi_reduction <add>, %70, %cst_28 [1] : vector<8x8xf32> to vector<8xf32>
    %72 = vector.shape_cast %71 : vector<8xf32> to vector<8x1xf32>
    %73 = tpu.reciprocal %72 {approx = true} : vector<8x1xf32> -> vector<8x1xf32>
    %74 = vector.broadcast %73 : vector<8x1xf32> to vector<8x8xf32>
    %75 = arith.mulf %70, %74 : vector<8x8xf32>
    %cst_29 = arith.constant dense<0.000000e+00> : vector<8x16xf32>
    %76 = tpu.matmul %75, %64, %cst_29 {dimension_numbers = #tpu.dot_dimension_numbers<[1], [0], [0], [1], [0, 0, 1, 1], [], []>} : vector<8x8xf32>, vector<8x16xf32>, vector<8x16xf32> -> vector<8x16xf32>
    %c48 = arith.constant 48 : index
    %c0_30 = arith.constant 0 : index
    %77 = vector.load %arg4[%c48, %c0_30] : memref<64x64xf32, #tpu.memory_space<vmem>>, vector<16x64xf32>
    %cst_31 = arith.constant dense<0.000000e+00> : vector<8x64xf32>
    %78 = tpu.matmul %76, %77, %cst_31 {dimension_numbers = #tpu.dot_dimension_numbers<[1], [0], [0], [1], [0, 0, 1, 1], [], []>} : vector<8x16xf32>, vector<16x64xf32>, vector<8x64xf32> -> vector<8x64xf32>
    %79 = arith.addf %61, %78 : vector<8x64xf32>
    %c0_32 = arith.constant 0 : index
    %c0_33 = arith.constant 0 : index
    %80 = vector.load %arg5[%c0_32, %c0_33] : memref<1x64xf32, #tpu.memory_space<vmem>>, vector<1x64xf32>
    %81 = vector.broadcast %80 : vector<1x64xf32> to vector<8x64xf32>
    %82 = arith.addf %79, %81 : vector<8x64xf32>
    %c0_34 = arith.constant 0 : index
    %c0_35 = arith.constant 0 : index
    %c0_36 = arith.constant 0 : index
    %83 = vector.load %arg6[%c0_34, %c0_35, %c0_36] : memref<1x8x64xf32, #tpu.memory_space<vmem>>, vector<1x8x64xf32>
    %84 = vector.shape_cast %83 : vector<1x8x64xf32> to vector<8x64xf32>
    %85 = vector.shape_cast %82 : vector<8x64xf32> to vector<1x8x64xf32>
    tpu.vector_store %arg6[%c0_34, %c0_35, %c0_36], %85 {strides = array<i32>} : memref<1x8x64xf32, #tpu.memory_space<vmem>>, vector<1x8x64xf32>,
    return
  }
  func.func @transform_0(%arg0: i32) -> (i32, i32, i32) {
    %c0_i32 = arith.constant 0 : i32
    %c0_i32_0 = arith.constant 0 : i32
    %c0_i32_1 = arith.constant 0 : i32
    return %arg0, %c0_i32, %c0_i32_0 : i32, i32, i32
  }
  func.func @transform_1(%arg0: i32) -> (i32, i32) {
    %c0_i32 = arith.constant 0 : i32
    %c0_i32_0 = arith.constant 0 : i32
    %c0_i32_1 = arith.constant 0 : i32
    return %c0_i32, %c0_i32_0 : i32, i32
  }
  func.func @transform_2(%arg0: i32) -> (i32, i32) {
    %c0_i32 = arith.constant 0 : i32
    %c0_i32_0 = arith.constant 0 : i32
    %c0_i32_1 = arith.constant 0 : i32
    return %c0_i32, %c0_i32_0 : i32, i32
  }
  func.func @transform_3(%arg0: i32) -> (i32, i32) {
    %c0_i32 = arith.constant 0 : i32
    %c0_i32_0 = arith.constant 0 : i32
    %c0_i32_1 = arith.constant 0 : i32
    return %c0_i32, %c0_i32_0 : i32, i32
  }
  func.func @transform_4(%arg0: i32) -> (i32, i32) {
    %c0_i32 = arith.constant 0 : i32
    %c0_i32_0 = arith.constant 0 : i32
    %c0_i32_1 = arith.constant 0 : i32
    return %c0_i32, %c0_i32_0 : i32, i32
  }
  func.func @transform_5(%arg0: i32) -> (i32, i32, i32) {
    %c0_i32 = arith.constant 0 : i32
    %c0_i32_0 = arith.constant 0 : i32
    %c0_i32_1 = arith.constant 0 : i32
    return %arg0, %c0_i32, %c0_i32_0 : i32, i32, i32
  }
}

</mosaic_0001>

<bundles_post_ra>
// kernel: tpu_custom_call.1
= control target key start
LH: loop header
LB: loop body
LE: loop exit
PB: predicated region body
PF: predicated region fallthrough
CT: control target
= control target key end

     0   :  { %10 = vsyncpa [#allocation3], 0  ;;  %s2137_s0 = inlined_call_operand.hbm [shape: f32[2,8,64], index: 0, kind: input, shape index: {}]   ;;  %s2138_s1 = inlined_call_operand.hbm [shape: f32[64,192], index: 1, kind: input, shape index: {}]   ;;  %s2139_s2 = inlined_call_operand.vmem [shape: f32[1,192], index: 2, kind: input, shape index: {}]   ;;  %s2140_s3 = inlined_call_operand.hbm [shape: f32[64,64], index: 3, kind: input, shape index: {}]   ;;  %s2141_s4 = inlined_call_operand.vmem [shape: f32[1,64], index: 4, kind: input, shape index: {}]   ;;  %s2142_s5 = inlined_call_operand.hbm [shape: f32[2,8,64], index: 5, kind: output, shape index: {}]  }
   0x1   :  { %12 = vsyncpa [#allocation3 + $0x1], 0 }
   0x2   :  { %13 = vsyncpa [#allocation6], 0 }
   0x3   :  { %14 = vsyncpa [#allocation4], 0 }
   0x4   :  { %16 = vsyncpa [#allocation4 + $0x1], 0  ;;  %s1869_s18 = smov 0   ;;  %s1871_s19 = smov 0  }
   0x5   :  { %s1873_s20 = smov 0   ;;  %s1875_s21 = smov 0  }
   0x6 LB: > { %s1890_s22 = sadd.s32 4294967295, %s1820_s21   ;;  %s1446_s23 = sadd.s32 4294967294, %s1820_s21   ;;  %s1820_s21 = sphi %s1875_s21, %s2164_s21   ;;  %s1816_s20 = sphi %s1873_s20, %s2163_s20   ;;  %s1812_s19 = sphi %s1871_s19, %s2162_s19   ;;  %s1808_s18 = sphi %s1869_s18, %s2161_s18  }
   0x7   : > { %p42_p0 = scmp.ne.s32.totalorder %s1812_s19, %s1808_s18  ;;  %p2143_p1 = scmp.eq.s32.totalorder %s1890_s22, 0 }
   0x8   : > { %p156_p3 = scmp.eq.s32.totalorder %s1446_s23, 1  ;;  %p1447_p5 = scmp.ge.s32.totalorder %s1820_s21, 1 }
   0x9   : > { %p1899_p4 = por %p2143_p1, %p42_p0  ;;  %p163_p7 = scmp.lt.s32.totalorder %s1820_s21, 3 }
   0xa   : > { %p1904_p6 = por %p156_p3, %p42_p0  ;;  %s1822_s27 = smov [#allocation5]  }
   0xb   : > { %s2147_s24 = scalar_select %p1899_p4, 1, 0 }
   0xc   : > { %s2148_s25 = scalar_select %p1904_p6, 1, 0 }
   0xd   : > { %p1909_p8 = pnand %p1447_p5, %p163_p7  ;;  %s175_s28 = sshll.u32 %s1822_s27, 4  ;;  %s176_s28 = int_to_ptr.vmem [resolvable:$true] %s175_s28 }
   0xe   : > { %s1823_s30 = smov [#allocation7]   ;;  %s1683_s7 = scalar_lea.vmem %s176_s28, 2048 }
   0xf   : > { %s2149_s26 = scalar_select %p1909_p8, 1, 0 }
  0x10   : > { %p1588_p9 = pneg %p1909_p8  ;;  %s191_s6 = sshll.u32 %s1823_s30, 4  ;;  %s192_s6 = int_to_ptr.vmem [resolvable:$true] %s191_s6 }
  0x11   : > { %p1684_p13 = scmp.ne.s32.totalorder %s176_s28, %s1683_s7  ;;  %p1691_p5 = scmp.lt.s32.totalorder %s176_s28, %s176_s28 }
  0x12   : > { %p1918_p11 = pnand %p1588_p9, %p2143_p1  ;;  %p1692_p7 = scmp.lt.s32.totalorder %s1683_s7, %s1683_s7 }
  0x14   : > { %p1674_p12 = pneg %p1918_p11  ;;  %p1693_p10 = por %p1692_p7, %p1691_p5 }
  0x16   : > { %p1686_p0 = pnand %p1684_p13, %p1674_p12 }
  0x18   : > { %p1687_p3 = pneg %p1686_p0 }
  0x1a   : > { %p1694_p9 = pnand %p1693_p10, %p1687_p3 }
  0x1c   : > { %1697 = shalt.err (!%p1694_p9)
}
  0x1d   : > { %s1824_s8 = smov 256   ;;  %s1825_s9 = smov 16  }
  0x1e   : > { %1591 = dma.hbm_to_vmem [thread:$0]  (!%p1918_p11), %s2138_s1, 2048, %s176_s28, [#allocation6], %s1824_s8, %s1824_s8, %s1825_s9  }
  0x1f   : > { %s1709_s12 = scalar_lea.vmem %s192_s6, 1024  ;;  %p1717_p2 = scmp.lt.s32.totalorder %s192_s6, %s192_s6 }
  0x20   : > { %p1710_p1 = scmp.ne.s32.totalorder %s192_s6, %s1709_s12  ;;  %p1718_p6 = scmp.lt.s32.totalorder %s1709_s12, %s1709_s12 }
  0x22   : > { %p1712_p13 = pnand %p1710_p1, %p1674_p12  ;;  %p1719_p5 = por %p1718_p6, %p1717_p2 }
  0x24   : > { %p1713_p0 = pneg %p1712_p13 }
  0x26   : > { %p1720_p10 = pnand %p1719_p5, %p1713_p0 }
  0x28   : > { %1723 = shalt.err (!%p1720_p10)
}
  0x29   : > { %s1826_s13 = smov 128   ;;  %s1827_s14 = smov 8  }
  0x2a   : > { %1594 = dma.hbm_to_vmem [thread:$0]  (!%p1918_p11), %s2140_s3, 1024, %s192_s6, [#allocation6], %s1826_s13, %s1826_s13, %s1827_s14  }
  0x2b   : > { %s1941_s17 = sadd.s32 1, %s1820_s21   ;;  %s29_s27 = sadd.s32 1, %s1816_s20 }
  0x2c   : > { %s26_s23 = ssub.s32 %s1820_s21, %s1941_s17  ;;  %p36_p2 = scmp.ne.s32.totalorder %s1816_s20, %s1812_s19 }
  0x2d   : > { %p27_p1 = scmp.eq.s32.totalorder %s26_s23, 0  ;;  %p37_p6 = scmp.eq.s32.totalorder %s1820_s21, 0 }
  0x2e   : > { %p2151_p3 = scmp.eq.s32.totalorder %s1890_s22, 1  ;;  %p1605_p9 = scmp.lt.s32.totalorder %s1820_s21, 2 }
  0x2f   : > { %s1950_s28 = scalar_select %p27_p1, %s1816_s20, %s29_s27  }
  0x30   : > { %p38_p12 = por %p37_p6, %p36_p2  ;;  %p1954_p7 = por %p2151_p3, %p36_p2 }
  0x31   : > { %s208_s29 = sand.u32 1, %s1816_s20   ;;  %s1452_s6 = sshll.u32 %s1820_s21, 7 }
  0x32   : > { %s2152_s30 = scalar_select %p1954_p7, 1, 0 }
  0x33   : > { %s1451_s7 = sshll.u32 %s208_s29, 3  ;;  %s1964_s10 = scalar_lea.hbm %s2137_s0, %s1452_s6 }
  0x34   : > { %s212_s11 = scalar_lea.vmem [#allocation2], %s1451_s7  ;;  %p1966_p11 = pnand %p1605_p9, %p38_p12 }
  0x35   : > { %s219_s12 = sshll.u32 %s212_s11, 4  ;;  %s209_s14 = scalar_lea.sflag [#allocation3], %s208_s29  ;;  %s220_s12 = int_to_ptr.vmem [resolvable:$true] %s219_s12 }
  0x36   : > { %s1724_s15 = scalar_lea.hbm %s1964_s10, 128  ;;  %p1726_p0 = pneg %p1966_p11 }
  0x37   : > { %p1725_p13 = scmp.ne.s32.totalorder %s1964_s10, %s1724_s15  ;;  %s1729_s27 = scalar_lea.hbm %s2137_s0, 256 }
  0x38   : > { %p1730_p1 = scmp.lt.s32.totalorder %s1964_s10, %s2137_s0  ;;  %p1731_p2 = scmp.lt.s32.totalorder %s1729_s27, %s1724_s15 }
  0x39   : > { %p1727_p5 = pnand %p1726_p0, %p1725_p13 }
  0x3a   : > { %p1732_p6 = por %p1731_p2, %p1730_p1 }
  0x3b   : > { %p1728_p10 = pneg %p1727_p5 }
  0x3d   : > { %p1733_p12 = pnand %p1732_p6, %p1728_p10 }
  0x3f   : > { %1736 = shalt.err (!%p1733_p12)
}
  0x40   : > { %s1737_s8 = scalar_lea.vmem %s220_s12, 128  ;;  %s1828_s29 = smov [#allocation2]  }
  0x41   : > { %p1738_p3 = scmp.ne.s32.totalorder %s220_s12, %s1737_s8  ;;  %s1742_s9 = sshll.u32 %s1828_s29, 4  ;;  %s1743_s9 = int_to_ptr.vmem [resolvable:$false] %s1742_s9 }
  0x42   : > { %s1744_s11 = scalar_lea.vmem %s1743_s9, 256  ;;  %p1745_p13 = scmp.lt.s32.totalorder %s220_s12, %s1743_s9 }
  0x43   : > { %p1740_p9 = pnand %p1738_p3, %p1726_p0  ;;  %p1746_p5 = scmp.lt.s32.totalorder %s1744_s11, %s1737_s8 }
  0x45   : > { %p1741_p7 = pneg %p1740_p9  ;;  %p1747_p4 = por %p1746_p5, %p1745_p13 }
  0x47   : > { %p1748_p8 = pnand %p1747_p4, %p1741_p7 }
  0x49   : > { %1751 = shalt.err (!%p1748_p8)
}
  0x4a   : > { %1598 = dma.hbm_to_vmem [thread:$0]  (!%p1966_p11), %s1964_s10, 128, %s220_s12, %s209_s14  }
  0x4b   : > { %p2154_p10 = scmp.ne.s32.totalorder %s2149_s26, 0 }
  0x4c   : > { %s1987_s15 = sand.u32 (!%p2154_p10), 1, %s1812_s19   ;;  %p2155_p4 = scmp.ne.s32.totalorder (!%p2154_p10), %s2147_s24, 0 }
  0x4d   : > { %228 = sbr.rel (%p2154_p10) target bundleno = 3045 (0xbe5), region = 40  ;;  %s1454_s16 = sshll.u32 (!%p2154_p10), %s1987_s15, 3 }
  0x4e   : > { %s231_s23 = scalar_lea.sflag (!%p2154_p10), [#allocation3], %s1987_s15  ;;  %s1993_s27 = scalar_lea.vmem (!%p2154_p10), [#allocation2], %s1454_s16 }
  0x52   : > { %1795 = dma.done.wait (%p2155_p4), %s231_s23, 128  }
  0x53   : > { %1797 = vsyncadd (%p2155_p4), %s231_s23, 4294967168  ;;  %p2156_p8 = scmp.eq.s32.totalorder %s1890_s22, 0 }
  0x55   : > { %1799 = dma.done.wait (%p2156_p8), [#allocation6], 3072   ;;  %p2157_p7 = pmov %p2156_p8 }
  0x56   : > { %v1829_v0 = vmov 0.0   ;;  %v285_v1 = vld [vmem:[#allocation5 + $0x78] sm:$0xff]  ;;  %v284_v2 = vld [vmem:[#allocation5 + $0x70] sm:$0xff]  ;;  %v283_v3 = vld [vmem:[#allocation5 + $0x68] sm:$0xff]  ;;  %vm298_vm0 = vcmask 523264   ;;  %v288_v18 = vlaneseq  ;;  %vm1830_vm1 = vmmov 0  }
  0x57   : > { %1801 = vsyncadd (%p2157_p7), [#allocation6], 4294964224  ;;  %366 = vmatprep.mubr.f32.mxu0 %v1829_v0  ;;  %1508 = vmatprep.subr.mxu1 %v1829_v0  ;;  %v282_v4 = vld [vmem:[#allocation5 + $0x60] sm:$0xff]  ;;  %v281_v5 = vld [vmem:[#allocation5 + $0x58] sm:$0xff]  ;;  %s1831_s10 = smov 48   ;;  %s1832_s12 = smov 64  }
  0x58   : > { %318 = vmatprep.subr.mxu0 %v285_v1  ;;  %v280_v6 = vld [vmem:[#allocation5 + $0x50] sm:$0xff]  ;;  %v279_v7 = vld [vmem:[#allocation5 + $0x48] sm:$0xff]  ;;  %v278_v8 = vld [vmem:[#allocation5 + $0x40] sm:$0xff]  ;;  %v289_v19 = vshrl.u32 %v288_v18, 7  ;;  %1510 = vmatprep.mubr.msk.f32.mxu1 %vm1830_vm1, %v1829_v0  ;;  %vm376_vm2 = vcmask 130048   ;;  %vm451_vm3 = vcmask 64512  }
  0x59   : > { %319 = vmatpush1.msra.mxu0 %v284_v2  ;;  %v277_v9 = vld [vmem:[#allocation5 + $0x38] sm:$0xff]  ;;  %v276_v10 = vld [vmem:[#allocation5 + $0x30] sm:$0xff]  ;;  %v275_v11 = vld [vmem:[#allocation5 + $0x28] sm:$0xff]  ;;  %s1833_s13 = smov 112   ;;  %s1834_s14 = smov 96  }
  0x5a   : > { %320 = vmatprep.subr.mxu0 %v283_v3  ;;  %v274_v12 = vld [vmem:[#allocation5 + $0x20] sm:$0xff]  ;;  %v273_v13 = vld [vmem:[#allocation5 + $0x18] sm:$0xff]  ;;  %v272_v14 = vld [vmem:[#allocation5 + $0x10] sm:$0xff]  ;;  %v290_v20 = vsub.s32 0, %v289_v19  ;;  %v294_v25 = vsub.s32 1, %v289_v19  ;;  %s1835_s6 = smov 32  }
  0x5b   : > { %321 = vmatpush1.msra.mxu0 %v282_v4  ;;  %v271_v15 = vld [vmem:[#allocation5 + $0x8] sm:$0xff]  ;;  %v270_v16 = vld [vmem:[#allocation5] sm:$0xff]  ;;  %v269_v17 = vld [vmem:[%s1993_s27] sm:$0xff]  ;;  %s1836_s7 = smov 80   ;;  %s1837_s8 = smov 16  }
  0x5c   : > { %322 = vmatprep.subr.mxu0 %v281_v5  ;;  %v286_v21 = vld [vmem:[%s2139_s2] sm:$0x3]  ;;  %v705_v53 = vld [vmem:[#allocation7 + $0x18] sm:$0xff]  ;;  %v537_v59 = vld [vmem:[#allocation7 + $0x8] sm:$0xff]  ;;  %s1477_s11 = sshll.u32 %s1890_s22, 7  ;;  %s268_s23 = scalar_lea.vmem [#allocation8], %s1454_s16 }
  0x5d   : > { %323 = vmatpush1.msra.mxu0 %v280_v6  ;;  %v291_v22 = vrot.slane %v286_v21, %v290_v20  ;;  %v295_v26 = vrot.slane %v286_v21, %v294_v25  ;;  %v704_v54 = vld [vmem:[#allocation7 + $0x10] sm:$0xff]  ;;  %v536_v60 = vld [vmem:[#allocation7] sm:$0xff]  ;;  %s1357_s27 = sshll.u32 %s268_s23, 4  ;;  %p2158_p0 = scmp.ne.s32.totalorder %s2152_s30, 0  ;;  %s1358_s27 = int_to_ptr.vmem [resolvable:$true] %s1357_s27 }
  0x5e   : > { %324 = vmatprep.subr.mxu0 %v279_v7  ;;  %v1017_v21 = vld [vmem:[#allocation7 + $0x20] sm:$0xff]  ;;  %s1838_s22 = smov [#allocation8]  }
  0x5f   : > { %325 = vmatpush1.msra.mxu0 %v278_v8 }
  0x60   : > { %326 = vmatprep.subr.mxu0 %v277_v9 }
  0x61   : > { %327 = vmatpush1.msra.mxu0 %v276_v10 }
  0x62   : > { %328 = vmatprep.subr.mxu0 %v275_v11 }
  0x63   : > { %329 = vmatpush1.msra.mxu0 %v274_v12 }
  0x64   : > { %330 = vmatprep.subr.mxu0 %v273_v13 }
  0x65   : > { %331 = vmatpush1.msra.mxu0 %v272_v14 }
  0x66   : > { %332 = vmatprep.subr.mxu0 %v271_v15  ;;  %v1018_v15 = vld [vmem:[#allocation7 + $0x28] sm:$0xff] }
  0x67   : > { %333 = vmatpush1.msra.mxu0 %v270_v16 }
  0x68   : > { %1458 = vmatmul.mubr.msk.f32.vlgmr.msra.gmra.mxu0 %vm298_vm0, %v269_v17  ;;  %1528 = vmatprep.subr.mxu0 %v1829_v0 }
  0x69   : > { %1532 = vmatprep.mubr.msk.f32.mxu0 %vm1830_vm1, %v1829_v0  ;;  %1529 = vmatpush3.msra.mxu0 %v705_v53 }
  0x6a   : > { %1530 = vmatprep.subr.mxu0 %v1829_v0 }
  0x6b   : > { %1531 = vmatpush3.msra.mxu0 %v704_v54 }
  0x6c   : > { %1542 = vmatprep.subr.mxu0 %v1829_v0 }
 0x128   : > { %v368_v23 = vpop.f32.mrf.mxu0 }
 0x129   : > { %v2015_v24 = vadd.f32 %v368_v23, %v291_v22 }
 0x12a   : > { %v370_v27 = vpop.f32.mrf.mxu0 }
 0x12b   : > { %540 = vrot.lane.b32.xlu1 %v2015_v24, %s1831_s10  ;;  %374 = vrot.lane.b32.xlu0 %v2015_v24, %s1832_s12  ;;  %v2021_v29 = vadd.f32 %v370_v27, %v295_v26  ;;  %s1355_s10 = scalar_lea.hbm %s2142_s5, %s1477_s11  ;;  %s1344_s12 = scalar_lea.sflag [#allocation4], %s1987_s15 }
 0x19d   : > { %v375_v28 = vpop.permute.xlu0 %374  ;;  %v541_v38 = vpop.permute.xlu1 %540 }
 0x19e   : > { %1509 = vmatpush3.xpose.msk.msra.mxu1 %vm376_vm2, %v375_v28 }
 0x19f   : > { %1513 = vmatprep.subr.mxu1 %v1829_v0 }
 0x1a1   : > { %1511 = vmatmul.mubr.msk.f32.vlgmr.msra.gmra.mxu1 %vm376_vm2, %v2015_v24 }
 0x1a2   : > { %1514 = vmatpush3.msra.mxu1 %v2021_v29  ;;  %1515 = vmatprep.mubr.msk.f32.mxu1 %vm1830_vm1, %v1829_v0 }
 0x1a3   : > { %1518 = vmatprep.subr.mxu1 %v1829_v0 }
 0x261   : > { %v447_v30 = vpop.f32.mrf.mxu1 }
 0x262   : > { %v452_v31 = vsel %vm451_vm3, %v447_v30, -inf }
 0x263   : > { %453 = vmax.xlane.f32.xlu0 %v452_v31  ;;  %v1512_v32 = vpop.f32.mrf.mxu1 }
 0x2ec   : > { %v454_v33 = vpop.xlane.xlu0 %453 }
 0x2ed   : > { %v455_v34 = vsub.f32 %v447_v30, %v454_v33 }
 0x2ef   : > { %v456_v35 = vmul.f32 1.442695, %v455_v34  ;;  %v1259_v34 = vld [vmem:[#allocation7 + $0x38] sm:$0xff] }
 0x2f1   : > { %1656 = vpow2.f32 %v456_v35  ;;  %v1258_v35 = vld [vmem:[#allocation7 + $0x30] sm:$0xff] }
 0x2fe   : > { %v1657_v36 = vpop.eup %1656 }
 0x2ff   : > { %v458_v37 = vsel %vm451_vm3, %v1657_v36, 0.0 }
 0x300   : > { %459 = vadd.xlane.f32.xlu1 %v458_v37 }
 0x311   : > { %538 = vrot.lane.b32.xlu1 %v2015_v24, %s1833_s13 }
 0x389   : > { %v460_v39 = vpop.xlane.xlu1 %459 }
 0x38a   : > { %1658 = vrcp.f32 %v460_v39 }
 0x38d   : > { %v539_v42 = vpop.permute.xlu1 %538 }
 0x397   : > { %v1659_v40 = vpop.eup %1658 }
 0x398   : > { %v462_v41 = vmul.f32 %v1659_v40, %v1657_v36 }
 0x39a   : > { %1516 = vmatmul.mubr.msk.f32.vlgmr.msra.gmra.mxu1 %vm451_vm3, %v462_v41 }
 0x39b   : > { %1519 = vmatpush3.xpose.msk.msra.mxu1 %vm376_vm2, %v541_v38  ;;  %1520 = vmatprep.mubr.msk.f32.mxu1 %vm1830_vm1, %v1829_v0 }
 0x39c   : > { %1523 = vmatprep.subr.mxu1 %v1829_v0 }
 0x39e   : > { %1521 = vmatmul.mubr.msk.f32.vlgmr.msra.gmra.mxu1 %vm376_vm2, %v539_v42 }
 0x39f   : > { %1525 = vmatprep.mubr.msk.f32.mxu1 %vm1830_vm1, %v1829_v0 }
 0x45a   : > { %v532_v43 = vpop.f32.mrf.mxu1 }
 0x45c   : > { %v1517_v44 = vpop.f32.mrf.mxu1 }
 0x45d   : > { %v1475_v44 = vld [vmem:[%s2141_s4] ss:$0 sm:$0xff] }
 0x45e   : > { %v612_v45 = vpop.f32.mrf.mxu1 }
 0x45f   : > { %v616_v46 = vsel %vm451_vm3, %v612_v45, -inf }
 0x460   : > { %617 = vmax.xlane.f32.xlu1 %v616_v46  ;;  %v1522_v47 = vpop.f32.mrf.mxu1 }
 0x471   : > { %852 = vrot.lane.b32.xlu1 %v2015_v24, %s1834_s14 }
 0x4e9   : > { %v618_v48 = vpop.xlane.xlu1 %617 }
 0x4ea   : > { %v619_v49 = vsub.f32 %v612_v45, %v618_v48 }
 0x4ec   : > { %v620_v50 = vmul.f32 1.442695, %v619_v49 }
 0x4ed   : > { %v853_v1 = vpop.permute.xlu1 %852 }
 0x4ee   : > { %1660 = vpow2.f32 %v620_v50 }
 0x4fb   : > { %v1661_v51 = vpop.eup %1660 }
 0x4fc   : > { %v622_v52 = vsel %vm451_vm3, %v1661_v51, 0.0 }
 0x4fd   : > { %623 = vadd.xlane.f32.xlu0 %v622_v52 }
 0x513   : > { %628 = vrot.lane.b32.xlu0 %v2021_v29, %s1833_s13  ;;  %s1752_s13 = scalar_lea.vmem %s1358_s27, 128 }
 0x514   : > { %p1753_p11 = scmp.ne.s32.totalorder %s1358_s27, %s1752_s13 }
 0x516   : > { %p1754_p1 = pnand %p1753_p11, %p2158_p0 }
 0x517   : > { %854 = vrot.lane.b32.xlu0 %v2015_v24, %s1835_s6 }
 0x518   : > { %p1755_p2 = pneg %p1754_p1 }
 0x586   : > { %v624_v55 = vpop.xlane.xlu0 %623 }
 0x587   : > { %1662 = vrcp.f32 %v624_v55 }
 0x58a   : > { %v629_v56 = vpop.permute.xlu0 %628 }
 0x58b   : > { %1524 = vmatpush3.msra.mxu1 %v629_v56 }
 0x58c   : > { %1535 = vmatprep.subr.mxu1 %v1829_v0 }
 0x58e   : > { %v855_v62 = vpop.permute.xlu0 %854 }
 0x594   : > { %v1663_v57 = vpop.eup %1662 }
 0x595   : > { %v626_v58 = vmul.f32 %v1663_v57, %v1661_v51 }
 0x597   : > { %1526 = vmatmul.mubr.msk.f32.vlgmr.msra.gmra.mxu1 %vm451_vm3, %v626_v58 }
 0x598   : > { %1536 = vmatpush3.msra.mxu1 %v537_v59  ;;  %1539 = vmatprep.mubr.msk.f32.mxu1 %vm1830_vm1, %v1829_v0 }
 0x599   : > { %1537 = vmatprep.subr.mxu1 %v1829_v0 }
 0x59a   : > { %1538 = vmatpush3.msra.mxu1 %v536_v60 }
 0x59b   : > { %1540 = vmatmul.mubr.msk.f32.vlgmr.msra.gmra.mxu1 %vm376_vm2, %v532_v43  ;;  %1547 = vmatprep.subr.mxu1 %v1829_v0 }
 0x59c   : > { %1549 = vmatprep.mubr.msk.f32.mxu1 %vm1830_vm1, %v1829_v0 }
 0x657   : > { %v700_v61 = vpop.f32.mrf.mxu1 }
 0x658   : > { %1533 = vmatmul.mubr.msk.f32.vlgmr.msra.gmra.mxu0 %vm376_vm2, %v700_v61 }
 0x659   : > { %1543 = vmatpush3.xpose.msk.msra.mxu0 %vm376_vm2, %v855_v62  ;;  %v1527_v63 = vpop.f32.mrf.mxu1  ;;  %1544 = vmatprep.mubr.msk.f32.mxu0 %vm1830_vm1, %v1829_v0 }
 0x65a   : > { %1552 = vmatprep.subr.mxu0 %v1829_v0 }
 0x65b   : > { %v2062_v2 = vpop.f32.mrf.mxu1 }
 0x65c   : > { %1545 = vmatmul.mubr.msk.f32.vlgmr.msra.gmra.mxu0 %vm376_vm2, %v853_v1 }
 0x65d   : > { %v1541_v3 = vpop.f32.mrf.mxu1  ;;  %1556 = vmatprep.mubr.msk.f32.mxu0 %vm1830_vm1, %v1829_v0  ;;  %1553 = vmatpush3.msra.mxu0 %v1018_v15 }
 0x65e   : > { %1554 = vmatprep.subr.mxu0 %v1829_v0 }
 0x65f   : > { %1555 = vmatpush3.msra.mxu0 %v1017_v21 }
 0x660   : > { %1564 = vmatprep.subr.mxu0 %v1829_v0 }
 0x718   : > { %v775_v4 = vpop.f32.mrf.mxu0 }
 0x719   : > { %v849_v36 = vadd.f32 %v2062_v2, %v775_v4 }
 0x71a   : > { %v1534_v5 = vpop.f32.mrf.mxu0 }
 0x71c   : > { %v926_v6 = vpop.f32.mrf.mxu0 }
 0x71d   : > { %v930_v7 = vsel %vm451_vm3, %v926_v6, -inf }
 0x71e   : > { %931 = vmax.xlane.f32.xlu0 %v930_v7  ;;  %v1546_v8 = vpop.f32.mrf.mxu0 }
 0x734   : > { %941 = vrot.lane.b32.xlu0 %v2021_v29, %s1834_s14  ;;  %s1756_s14 = sshll.u32 %s1838_s22, 4  ;;  %s1757_s14 = int_to_ptr.vmem [resolvable:$false] %s1756_s14 }
 0x735   : > { %s1758_s16 = scalar_lea.vmem %s1757_s14, 256  ;;  %p1759_p6 = scmp.lt.s32.totalorder %s1358_s27, %s1757_s14 }
 0x736   : > { %p1760_p12 = scmp.lt.s32.totalorder %s1758_s16, %s1752_s13 }
 0x738   : > { %1093 = vrot.lane.b32.xlu0 %v2015_v24, %s1836_s7  ;;  %p1761_p3 = por %p1760_p12, %p1759_p6 }
 0x73a   : > { %p1762_p9 = pnand %p1761_p3, %p1755_p2 }
 0x7a7   : > { %v932_v9 = vpop.xlane.xlu0 %931 }
 0x7a8   : > { %v933_v10 = vsub.f32 %v926_v6, %v932_v9 }
 0x7aa   : > { %v934_v11 = vmul.f32 1.442695, %v933_v10 }
 0x7ab   : > { %v942_v12 = vpop.permute.xlu0 %941 }
 0x7ac   : > { %1664 = vpow2.f32 %v934_v11  ;;  %1548 = vmatpush3.msra.mxu1 %v942_v12 }
 0x7ad   : > { %1559 = vmatprep.subr.mxu1 %v1829_v0 }
 0x7af   : > { %v1094_v20 = vpop.permute.xlu0 %1093 }
 0x7b9   : > { %v1665_v13 = vpop.eup %1664 }
 0x7ba   : > { %v936_v14 = vsel %vm451_vm3, %v1665_v13, 0.0 }
 0x7bb   : > { %937 = vadd.xlane.f32.xlu1 %v936_v14 }
 0x7cc   : > { %1095 = vrot.lane.b32.xlu1 %v2015_v24, %s1837_s8 }
 0x844   : > { %v938_v16 = vpop.xlane.xlu1 %937 }
 0x845   : > { %1666 = vrcp.f32 %v938_v16 }
 0x848   : > { %v1096_v19 = vpop.permute.xlu1 %1095 }
 0x852   : > { %v1667_v17 = vpop.eup %1666 }
 0x853   : > { %v940_v18 = vmul.f32 %v1667_v17, %v1665_v13 }
 0x855   : > { %1550 = vmatmul.mubr.msk.f32.vlgmr.msra.gmra.mxu1 %vm451_vm3, %v940_v18 }
 0x856   : > { %1560 = vmatpush3.xpose.msk.msra.mxu1 %vm376_vm2, %v1096_v19  ;;  %1561 = vmatprep.mubr.msk.f32.mxu1 %vm1830_vm1, %v1829_v0 }
 0x857   : > { %1569 = vmatprep.subr.mxu1 %v1829_v0 }
 0x859   : > { %1562 = vmatmul.mubr.msk.f32.vlgmr.msra.gmra.mxu1 %vm376_vm2, %v1094_v20 }
 0x85a   : > { %1573 = vmatprep.mubr.msk.f32.mxu1 %vm1830_vm1, %v1829_v0  ;;  %1570 = vmatpush3.msra.mxu1 %v1259_v34 }
 0x85b   : > { %1571 = vmatprep.subr.mxu1 %v1829_v0 }
 0x85c   : > { %1572 = vmatpush3.msra.mxu1 %v1258_v35 }
 0x915   : > { %v1013_v22 = vpop.f32.mrf.mxu1 }
 0x916   : > { %1557 = vmatmul.mubr.msk.f32.vlgmr.msra.gmra.mxu0 %vm376_vm2, %v1013_v22 }
 0x917   : > { %v1551_v23 = vpop.f32.mrf.mxu1  ;;  %1566 = vmatprep.mubr.msk.f32.mxu0 %vm1830_vm1, %v1829_v0 }
 0x919   : > { %v1167_v24 = vpop.f32.mrf.mxu1 }
 0x91a   : > { %v1171_v25 = vsel %vm451_vm3, %v1167_v24, -inf }
 0x91b   : > { %1172 = vmax.xlane.f32.xlu0 %v1171_v25  ;;  %v1563_v26 = vpop.f32.mrf.mxu1 }
 0x931   : > { %1182 = vrot.lane.b32.xlu0 %v2021_v29, %s1836_s7 }
 0x9a4   : > { %v1173_v27 = vpop.xlane.xlu0 %1172 }
 0x9a5   : > { %v1174_v28 = vsub.f32 %v1167_v24, %v1173_v27 }
 0x9a7   : > { %v1175_v30 = vmul.f32 1.442695, %v1174_v28 }
 0x9a8   : > { %v1183_v31 = vpop.permute.xlu0 %1182 }
 0x9a9   : > { %1668 = vpow2.f32 %v1175_v30  ;;  %1565 = vmatpush3.msra.mxu0 %v1183_v31 }
 0x9b6   : > { %v1669_v32 = vpop.eup %1668 }
 0x9b7   : > { %v1177_v33 = vsel %vm451_vm3, %v1669_v32, 0.0 }
 0x9b8   : > { %1178 = vadd.xlane.f32.xlu1 %v1177_v33 }
 0x9d6   : > { %v1088_v29 = vpop.f32.mrf.mxu0 }
 0x9d7   : > { %v1092_v37 = vadd.f32 %v1088_v29, %v849_v36 }
 0x9d8   : > { %v1558_v38 = vpop.f32.mrf.mxu0 }
 0xa41   : > { %v1179_v39 = vpop.xlane.xlu1 %1178 }
 0xa42   : > { %1670 = vrcp.f32 %v1179_v39 }
 0xa4f   : > { %v1671_v40 = vpop.eup %1670 }
 0xa50   : > { %v1181_v41 = vmul.f32 %v1671_v40, %v1669_v32 }
 0xa52   : > { %1567 = vmatmul.mubr.msk.f32.vlgmr.msra.gmra.mxu0 %vm451_vm3, %v1181_v41 }
 0xb12   : > { %v1254_v42 = vpop.f32.mrf.mxu0 }
 0xb13   : > { %1574 = vmatmul.mubr.msk.f32.vlgmr.msra.gmra.mxu1 %vm376_vm2, %v1254_v42 }
 0xb14   : > { %v1568_v0 = vpop.f32.mrf.mxu0 }
 0xbd3   : > { %v1329_v43 = vpop.f32.mrf.mxu1 }
 0xbd4   : > { %v1333_v45 = vadd.f32 %v1329_v43, %v1092_v37 }
 0xbd5   : > { %v1575_v46 = vpop.f32.mrf.mxu1 }
 0xbd6   : > { %v1341_v47 = vadd.f32 %v1475_v44, %v1333_v45 }
 0xbd8   : > { %1342 = vst.msk [vmem:[%s268_s23] sm:$0xff] %vm298_vm0, %v1341_v47 }
 0xbd9   : > { %1765 = shalt.err (!%p1762_p9)
}
 0xbda   : > { %s1766_s6 = scalar_lea.hbm %s1355_s10, 128  ;;  %s1770_s8 = scalar_lea.hbm %s2142_s5, 256 }
 0xbdb   : > { %p1767_p13 = scmp.ne.s32.totalorder %s1355_s10, %s1766_s6  ;;  %p1771_p4 = scmp.lt.s32.totalorder %s1355_s10, %s2142_s5 }
 0xbdc   : > { %p1772_p8 = scmp.lt.s32.totalorder %s1770_s8, %s1766_s6 }
 0xbdd   : > { %p1768_p5 = pnand %p1767_p13, %p2158_p0 }
 0xbde   : > { %p1773_p7 = por %p1772_p8, %p1771_p4 }
 0xbdf   : > { %p1769_p10 = pneg %p1768_p5 }
 0xbe1   : > { %p1774_p11 = pnand %p1773_p7, %p1769_p10 }
 0xbe3   : > { %1777 = shalt.err (!%p1774_p11)
}
 0xbe4   : > { %1586 = dma.vmem_to_hbm [thread:$0]  (%p2158_p0), %s1358_s27, 128, %s1355_s10, %s1344_s12  }
 0xbe5 PF: > { %s1369_s11 = sand.u32 1, %s1808_s18   ;;  %p2159_p1 = scmp.ne.s32.totalorder %s2148_s25, 0 }
 0xbe6   : > { %p2160_p2 = scmp.ge.s32.totalorder %s1820_s21, 2  ;;  %s1370_s23 = scalar_lea.sflag [#allocation4], %s1369_s11 }
 0xbe8   : > { %p1600_p6 = pnand %p2160_p2, %p2159_p1 }
 0xbea   : > { %p1601_p12 = pneg %p1600_p6 }
 0xbec   : > { %1803 = dma.done.wait (%p1601_p12), %s1370_s23, 128  }
 0xbed   : > { %1805 = vsyncadd (%p1601_p12), %s1370_s23, 4294967168  ;;  %p19_p3 = scmp.ge.s32.totalorder %s1941_s17, 4   ;;  %s2161_s18 = smov %s1812_s19 }
 0xbee   : > { %s2162_s19 = smov %s1816_s20  ;;  %s2163_s20 = smov %s1950_s28 }
 0xbef   : > { %s2164_s21 = smov %s1941_s17  ;;  %21 = sbr.rel (!%p19_p3) target bundleno = 6 (0x6), region = 93 }
 0xbf4   :  { %1375 = vsyncpa [#allocation3], 1 }
 0xbf5   :  { %1377 = vsyncpa [#allocation3 + $0x1], 1 }
 0xbf6   :  { %1378 = vsyncpa [#allocation6], 1 }
 0xbf7   :  { %1379 = vsyncpa [#allocation4], 1 }
 0xbf8   :  { %1381 = vsyncpa [#allocation4 + $0x1], 1 }

</bundles_post_ra>
